<compile_context>
chip_gen: v5e
topology: v5e:2x2
jax: 0.10.0
libtpu: 0.0.40
codegen_flags: <defaults>
</compile_context>

<pallas_src>
import jax
import jax.numpy as jnp
from jax.experimental import pallas as pl
from jax.experimental.pallas import tpu as pltpu

BN_EPS = 1e-5


def _round_up(x, m):
    return ((x + m - 1) // m) * m


def downsample_forward(x_nchw, w_conv, b_conv, gamma, beta,
                       compute_dtype=jnp.bfloat16):
    """Forward of Downsample: Conv2d(k=3, s=2, p=1) + BatchNorm2d (batch stats).

    x_nchw: (N, Cin, H, W)        w_conv: (Cout, Cin, 3, 3) (PyTorch layout)
    b_conv, gamma, beta: (Cout,)  returns (N, Cout, Ho, Wo) float32
    """
    N, Cin, H, W = x_nchw.shape
    Cout = w_conv.shape[0]
    Ho = (H + 2 - 3) // 2 + 1
    Wo = (W + 2 - 3) // 2 + 1
    HW = Ho * Wo
    M = N * HW

    # Lane-pad Cout only when it is already >= 128: for small Cout the padded
    # HBM writeback would dwarf the lane-dense-store benefit.
    C_pad = _round_up(Cout, 128) if Cout >= 128 else Cout

    # ---- glue: padded NHWC -> parity planes (fused pass, no im2col) --------
    x_nhwc = jnp.transpose(x_nchw, (0, 2, 3, 1))
    x_pad = jnp.pad(x_nhwc, ((0, 0), (1, 1), (1, 1), (0, 0))).astype(compute_dtype)

    ee = x_pad[:, 0:2 * Ho + 1:2, 0:2 * Wo + 1:2, :]   # (N, Ho+1, Wo+1, Cin)
    eo = x_pad[:, 0:2 * Ho + 1:2, 1:2 * Wo:2, :]       # (N, Ho+1, Wo,   Cin)
    oe = x_pad[:, 1:2 * Ho:2, 0:2 * Wo + 1:2, :]       # (N, Ho,   Wo+1, Cin)
    oo = x_pad[:, 1:2 * Ho:2, 1:2 * Wo:2, :]           # (N, Ho,   Wo,   Cin)

    Re = (Ho + 1) * Wo   # flattened rows of the even-row planes
    # Six planes; every conv tap is a contiguous row window of one plane.
    e0 = ee[:, :, 0:Wo, :].reshape(N, Re, Cin)         # even rows, kw=0
    e1 = ee[:, :, 1:Wo + 1, :].reshape(N, Re, Cin)     # even rows, kw=2
    e2 = eo.reshape(N, Re, Cin)                        # even rows, kw=1
    o0 = oe[:, :, 0:Wo, :].reshape(N, HW, Cin)         # odd  rows, kw=0
    o1 = oe[:, :, 1:Wo + 1, :].reshape(N, HW, Cin)     # odd  rows, kw=2
    o2 = oo.reshape(N, HW, Cin)                        # odd  rows, kw=1

    # Weights per tap (t = kh*3 + kw): (9, Cin, C_pad); bias kept f32.
    w_taps = jnp.transpose(w_conv, (2, 3, 1, 0)).reshape(9, Cin, Cout)
    w_taps = jnp.pad(w_taps, ((0, 0), (0, 0), (0, C_pad - Cout))).astype(compute_dtype)
    b_row = jnp.pad(b_conv.astype(jnp.float32).reshape(1, Cout),
                    ((0, 0), (0, C_pad - Cout)))

    # tap t = kh*3+kw -> (plane index in [e0,e1,e2,o0,o1,o2], row offset)
    TAPS = ((0, 0), (2, 0), (1, 0),
            (3, 0), (5, 0), (4, 0),
            (0, Wo), (2, Wo), (1, Wo))

    def kernel(e0_ref, e1_ref, e2_ref, o0_ref, o1_ref, o2_ref,
               w_ref, b_ref, y_ref, stats_ref):
        planes = (e0_ref, e1_ref, e2_ref, o0_ref, o1_ref, o2_ref)
        acc = None
        for t, (p, r0) in enumerate(TAPS):
            patch = planes[p][0, r0:r0 + HW, :]            # (HW, Cin) static slice
            part = jnp.dot(patch, w_ref[t],
                           preferred_element_type=jnp.float32)
            acc = part if acc is None else acc + part
        # Per-image partial BN stats of the PRE-bias conv output (padded
        # channels contribute exactly zero; bias is folded analytically in glue).
        stats_ref[0, 0:1, :] = jnp.sum(acc, axis=0, keepdims=True)
        stats_ref[0, 1:2, :] = jnp.sum(acc * acc, axis=0, keepdims=True)
        y_ref[0] = (acc + b_ref[...]).astype(y_ref.dtype)

    # ---- explicit scoped-VMEM limit sized from the per-step footprint ------
    in_item = jnp.dtype(compute_dtype).itemsize
    plane_bytes = (3 * Re + 3 * HW) * Cin * in_item
    w_bytes = 9 * Cin * C_pad * in_item
    y_bytes = HW * C_pad * 4
    need = 2 * (plane_bytes + w_bytes + y_bytes + 3 * C_pad * 4) \
        + 4 * HW * C_pad * 4 + 2 * HW * Cin * in_item
    try:
        vmem_cap = int(pltpu.get_tpu_info().vmem_capacity_bytes)
    except Exception:
        vmem_cap = 64 << 20
    vmem_limit = int(min(max(need + (2 << 20), 16 << 20), int(0.75 * vmem_cap)))

    # TODO(synk): one image per grid step must fit VMEM; very large H*W*Cin
    # would need an ho-tiled manual-DMA variant (overlapping row strips).
    y_flat, stats = pl.pallas_call(
        kernel,
        out_shape=(
            jax.ShapeDtypeStruct((N, HW, C_pad), jnp.float32),
            jax.ShapeDtypeStruct((N, 2, C_pad), jnp.float32),
        ),
        grid_spec=pltpu.PrefetchScalarGridSpec(
            num_scalar_prefetch=0,
            grid=(N,),
            in_specs=[
                pl.BlockSpec((1, Re, Cin), lambda n: (n, 0, 0)),
                pl.BlockSpec((1, Re, Cin), lambda n: (n, 0, 0)),
                pl.BlockSpec((1, Re, Cin), lambda n: (n, 0, 0)),
                pl.BlockSpec((1, HW, Cin), lambda n: (n, 0, 0)),
                pl.BlockSpec((1, HW, Cin), lambda n: (n, 0, 0)),
                pl.BlockSpec((1, HW, Cin), lambda n: (n, 0, 0)),
                # TODO(synk): grid-invariant operands; pipeline_mode=pl.Buffered(1)
                # would single-buffer them on VMEM-tight v7x.
                pl.BlockSpec((9, Cin, C_pad), lambda n: (0, 0, 0)),
                pl.BlockSpec((1, C_pad), lambda n: (0, 0)),
            ],
            out_specs=[
                pl.BlockSpec((1, HW, C_pad), lambda n: (n, 0, 0)),
                pl.BlockSpec((1, 2, C_pad), lambda n: (n, 0, 0)),
            ],
        ),
        compiler_params=pltpu.CompilerParams(
            dimension_semantics=("parallel",),
            vmem_limit_bytes=vmem_limit),
    )(e0, e1, e2, o0, o1, o2, w_taps, b_row)

    # ---- glue: reduce per-image stat partials, fold bias, apply BN ---------
    stats_tot = jnp.sum(stats, axis=0)                 # (2, C_pad) f32
    mean0 = stats_tot[0, :Cout] / M                    # mean of pre-bias output
    var = jnp.maximum(stats_tot[1, :Cout] / M - mean0 * mean0, 0.0)
    mean = mean0 + b_conv.astype(jnp.float32)          # bias shifts mean only
    scale = gamma.astype(jnp.float32) * jax.lax.rsqrt(var + BN_EPS)
    shift = beta.astype(jnp.float32) - mean * scale

    # BN + channel slice + NHWC->NCHW fuse into one XLA pass over y.
    # TODO(synk): if the consumer accepts NHWC (or bf16) output, skip the
    # transpose / emit bf16 here to save another full pass of HBM bandwidth.
    y = y_flat[:, :, :Cout] * scale[None, None, :] + shift[None, None, :]
    return jnp.transpose(y.reshape(N, Ho, Wo, Cout), (0, 3, 1, 2))


def _reference_forward(x_nchw, w_conv, b_conv, gamma, beta):
    """Pure-JAX reference: lax conv + training-mode BatchNorm2d."""
    y = jax.lax.conv_general_dilated(
        x_nchw, w_conv, window_strides=(2, 2), padding=((1, 1), (1, 1)),
        dimension_numbers=("NCHW", "OIHW", "NCHW"))
    y = y + b_conv.reshape(1, -1, 1, 1)
    mean = jnp.mean(y, axis=(0, 2, 3), keepdims=True)
    var = jnp.mean((y - mean) ** 2, axis=(0, 2, 3), keepdims=True)
    y = (y - mean) / jnp.sqrt(var + BN_EPS)
    return y * gamma.reshape(1, -1, 1, 1) + beta.reshape(1, -1, 1, 1)


if __name__ == "__main__":
    key = jax.random.PRNGKey(0)
    kx, kw, kb = jax.random.split(key, 3)

    N, Cin, H, W = 2, 4, 16, 16
    Cout = 8   # patch_size == 2 in the PyTorch module -> stride-2 conv here

    x = jax.random.normal(kx, (N, Cin, H, W), dtype=jnp.float32)
    fan_in = Cin * 9
    bound = 1.0 / (fan_in ** 0.5)
    w_conv = jax.random.uniform(kw, (Cout, Cin, 3, 3), jnp.float32, -bound, bound)
    b_conv = jax.random.uniform(kb, (Cout,), jnp.float32, -bound, bound)
    gamma = jnp.ones((Cout,), jnp.float32)   # BatchNorm2d default init
    beta = jnp.zeros((Cout,), jnp.float32)

    fwd = jax.jit(downsample_forward, static_argnames=("compute_dtype",))
    ref = _reference_forward(x, w_conv, b_conv, gamma, beta)

    # f32 path: tight check against the lax.conv + BatchNorm reference.
    out_f32 = jax.block_until_ready(
        fwd(x, w_conv, b_conv, gamma, beta, compute_dtype=jnp.float32))
    assert out_f32.shape == (N, Cout, H // 2, W // 2), out_f32.shape
    assert jnp.allclose(out_f32, ref, atol=1e-4, rtol=1e-4), float(
        jnp.max(jnp.abs(out_f32 - ref)))

    # bf16 matmul path (default, MXU-rate on v5e/v6e): loose tolerance vs f32.
    out_bf16 = jax.block_until_ready(fwd(x, w_conv, b_conv, gamma, beta))
    assert jnp.allclose(out_bf16, ref, atol=5e-2, rtol=0.0), float(
        jnp.max(jnp.abs(out_bf16 - ref)))

    print("KERNEL_OK")
</pallas_src>

<mosaic_0001>
module attributes {stable_mosaic.version = 11 : i64} {
  func.func @kernel(%arg0: i32, %arg1: memref<1x72x4xf32, #tpu.memory_space<vmem>>, %arg2: memref<1x72x4xf32, #tpu.memory_space<vmem>>, %arg3: memref<1x72x4xf32, #tpu.memory_space<vmem>>, %arg4: memref<1x64x4xf32, #tpu.memory_space<vmem>>, %arg5: memref<1x64x4xf32, #tpu.memory_space<vmem>>, %arg6: memref<1x64x4xf32, #tpu.memory_space<vmem>>, %arg7: memref<9x4x8xf32, #tpu.memory_space<vmem>>, %arg8: memref<1x8xf32, #tpu.memory_space<vmem>>, %arg9: memref<1x64x8xf32, #tpu.memory_space<vmem>>, %arg10: memref<1x2x8xf32, #tpu.memory_space<vmem>>) attributes {dimension_semantics = [#tpu.dimension_semantics<parallel>], iteration_bounds = array<i64: 2>, scalar_prefetch = 0 : i64, scratch_operands = 0 : i64, tpu.core_type = #tpu.core_type<tc>, window_params = [{transform_indices = @transform_0, window_bounds = array<i64: 1, 72, 4>}, {transform_indices = @transform_1, window_bounds = array<i64: 1, 72, 4>}, {transform_indices = @transform_2, window_bounds = array<i64: 1, 72, 4>}, {transform_indices = @transform_3, window_bounds = array<i64: 1, 64, 4>}, {transform_indices = @transform_4, window_bounds = array<i64: 1, 64, 4>}, {transform_indices = @transform_5, window_bounds = array<i64: 1, 64, 4>}, {pipeline_mode = #tpu.pipeline_mode<synchronous>, transform_indices = @transform_6, window_bounds = array<i64: 9, 4, 8>}, {pipeline_mode = #tpu.pipeline_mode<synchronous>, transform_indices = @transform_7, window_bounds = array<i64: 1, 8>}, {transform_indices = @transform_8, window_bounds = array<i64: 1, 64, 8>}, {transform_indices = @transform_9, window_bounds = array<i64: 1, 2, 8>}]} {
    %c0 = arith.constant 0 : index
    %c0_0 = arith.constant 0 : index
    %c0_1 = arith.constant 0 : index
    %0 = vector.load %arg1[%c0, %c0_0, %c0_1] : memref<1x72x4xf32, #tpu.memory_space<vmem>>, vector<1x64x4xf32>
    %1 = vector.shape_cast %0 : vector<1x64x4xf32> to vector<64x4xf32>
    %c0_2 = arith.constant 0 : index
    %c0_3 = arith.constant 0 : index
    %c0_4 = arith.constant 0 : index
    %2 = vector.load %arg7[%c0_2, %c0_3, %c0_4] : memref<9x4x8xf32, #tpu.memory_space<vmem>>, vector<1x4x8xf32>
    %3 = vector.shape_cast %2 : vector<1x4x8xf32> to vector<4x8xf32>
    %cst = arith.constant dense<0.000000e+00> : vector<64x8xf32>
    %4 = tpu.matmul %1, %3, %cst {dimension_numbers = #tpu.dot_dimension_numbers<[1], [0], [0], [1], [0, 0, 1, 1], [], []>} : vector<64x4xf32>, vector<4x8xf32>, vector<64x8xf32> -> vector<64x8xf32>
    %c0_5 = arith.constant 0 : index
    %c0_6 = arith.constant 0 : index
    %c0_7 = arith.constant 0 : index
    %5 = vector.load %arg3[%c0_5, %c0_6, %c0_7] : memref<1x72x4xf32, #tpu.memory_space<vmem>>, vector<1x64x4xf32>
    %6 = vector.shape_cast %5 : vector<1x64x4xf32> to vector<64x4xf32>
    %c1 = arith.constant 1 : index
    %c0_8 = arith.constant 0 : index
    %c0_9 = arith.constant 0 : index
    %7 = vector.load %arg7[%c1, %c0_8, %c0_9] : memref<9x4x8xf32, #tpu.memory_space<vmem>>, vector<1x4x8xf32>
    %8 = vector.shape_cast %7 : vector<1x4x8xf32> to vector<4x8xf32>
    %cst_10 = arith.constant dense<0.000000e+00> : vector<64x8xf32>
    %9 = tpu.matmul %6, %8, %cst_10 {dimension_numbers = #tpu.dot_dimension_numbers<[1], [0], [0], [1], [0, 0, 1, 1], [], []>} : vector<64x4xf32>, vector<4x8xf32>, vector<64x8xf32> -> vector<64x8xf32>
    %10 = arith.addf %4, %9 : vector<64x8xf32>
    %c0_11 = arith.constant 0 : index
    %c0_12 = arith.constant 0 : index
    %c0_13 = arith.constant 0 : index
    %11 = vector.load %arg2[%c0_11, %c0_12, %c0_13] : memref<1x72x4xf32, #tpu.memory_space<vmem>>, vector<1x64x4xf32>
    %12 = vector.shape_cast %11 : vector<1x64x4xf32> to vector<64x4xf32>
    %c2 = arith.constant 2 : index
    %c0_14 = arith.constant 0 : index
    %c0_15 = arith.constant 0 : index
    %13 = vector.load %arg7[%c2, %c0_14, %c0_15] : memref<9x4x8xf32, #tpu.memory_space<vmem>>, vector<1x4x8xf32>
    %14 = vector.shape_cast %13 : vector<1x4x8xf32> to vector<4x8xf32>
    %cst_16 = arith.constant dense<0.000000e+00> : vector<64x8xf32>
    %15 = tpu.matmul %12, %14, %cst_16 {dimension_numbers = #tpu.dot_dimension_numbers<[1], [0], [0], [1], [0, 0, 1, 1], [], []>} : vector<64x4xf32>, vector<4x8xf32>, vector<64x8xf32> -> vector<64x8xf32>
    %16 = arith.addf %10, %15 : vector<64x8xf32>
    %c0_17 = arith.constant 0 : index
    %c0_18 = arith.constant 0 : index
    %c0_19 = arith.constant 0 : index
    %17 = vector.load %arg4[%c0_17, %c0_18, %c0_19] : memref<1x64x4xf32, #tpu.memory_space<vmem>>, vector<1x64x4xf32>
    %18 = vector.shape_cast %17 : vector<1x64x4xf32> to vector<64x4xf32>
    %c3 = arith.constant 3 : index
    %c0_20 = arith.constant 0 : index
    %c0_21 = arith.constant 0 : index
    %19 = vector.load %arg7[%c3, %c0_20, %c0_21] : memref<9x4x8xf32, #tpu.memory_space<vmem>>, vector<1x4x8xf32>
    %20 = vector.shape_cast %19 : vector<1x4x8xf32> to vector<4x8xf32>
    %cst_22 = arith.constant dense<0.000000e+00> : vector<64x8xf32>
    %21 = tpu.matmul %18, %20, %cst_22 {dimension_numbers = #tpu.dot_dimension_numbers<[1], [0], [0], [1], [0, 0, 1, 1], [], []>} : vector<64x4xf32>, vector<4x8xf32>, vector<64x8xf32> -> vector<64x8xf32>
    %22 = arith.addf %16, %21 : vector<64x8xf32>
    %c0_23 = arith.constant 0 : index
    %c0_24 = arith.constant 0 : index
    %c0_25 = arith.constant 0 : index
    %23 = vector.load %arg6[%c0_23, %c0_24, %c0_25] : memref<1x64x4xf32, #tpu.memory_space<vmem>>, vector<1x64x4xf32>
    %24 = vector.shape_cast %23 : vector<1x64x4xf32> to vector<64x4xf32>
    %c4 = arith.constant 4 : index
    %c0_26 = arith.constant 0 : index
    %c0_27 = arith.constant 0 : index
    %25 = vector.load %arg7[%c4, %c0_26, %c0_27] : memref<9x4x8xf32, #tpu.memory_space<vmem>>, vector<1x4x8xf32>
    %26 = vector.shape_cast %25 : vector<1x4x8xf32> to vector<4x8xf32>
    %cst_28 = arith.constant dense<0.000000e+00> : vector<64x8xf32>
    %27 = tpu.matmul %24, %26, %cst_28 {dimension_numbers = #tpu.dot_dimension_numbers<[1], [0], [0], [1], [0, 0, 1, 1], [], []>} : vector<64x4xf32>, vector<4x8xf32>, vector<64x8xf32> -> vector<64x8xf32>
    %28 = arith.addf %22, %27 : vector<64x8xf32>
    %c0_29 = arith.constant 0 : index
    %c0_30 = arith.constant 0 : index
    %c0_31 = arith.constant 0 : index
    %29 = vector.load %arg5[%c0_29, %c0_30, %c0_31] : memref<1x64x4xf32, #tpu.memory_space<vmem>>, vector<1x64x4xf32>
    %30 = vector.shape_cast %29 : vector<1x64x4xf32> to vector<64x4xf32>
    %c5 = arith.constant 5 : index
    %c0_32 = arith.constant 0 : index
    %c0_33 = arith.constant 0 : index
    %31 = vector.load %arg7[%c5, %c0_32, %c0_33] : memref<9x4x8xf32, #tpu.memory_space<vmem>>, vector<1x4x8xf32>
    %32 = vector.shape_cast %31 : vector<1x4x8xf32> to vector<4x8xf32>
    %cst_34 = arith.constant dense<0.000000e+00> : vector<64x8xf32>
    %33 = tpu.matmul %30, %32, %cst_34 {dimension_numbers = #tpu.dot_dimension_numbers<[1], [0], [0], [1], [0, 0, 1, 1], [], []>} : vector<64x4xf32>, vector<4x8xf32>, vector<64x8xf32> -> vector<64x8xf32>
    %34 = arith.addf %28, %33 : vector<64x8xf32>
    %c0_35 = arith.constant 0 : index
    %c8 = arith.constant 8 : index
    %c0_36 = arith.constant 0 : index
    %35 = vector.load %arg1[%c0_35, %c8, %c0_36] : memref<1x72x4xf32, #tpu.memory_space<vmem>>, vector<1x64x4xf32>
    %36 = vector.shape_cast %35 : vector<1x64x4xf32> to vector<64x4xf32>
    %c6 = arith.constant 6 : index
    %c0_37 = arith.constant 0 : index
    %c0_38 = arith.constant 0 : index
    %37 = vector.load %arg7[%c6, %c0_37, %c0_38] : memref<9x4x8xf32, #tpu.memory_space<vmem>>, vector<1x4x8xf32>
    %38 = vector.shape_cast %37 : vector<1x4x8xf32> to vector<4x8xf32>
    %cst_39 = arith.constant dense<0.000000e+00> : vector<64x8xf32>
    %39 = tpu.matmul %36, %38, %cst_39 {dimension_numbers = #tpu.dot_dimension_numbers<[1], [0], [0], [1], [0, 0, 1, 1], [], []>} : vector<64x4xf32>, vector<4x8xf32>, vector<64x8xf32> -> vector<64x8xf32>
    %40 = arith.addf %34, %39 : vector<64x8xf32>
    %c0_40 = arith.constant 0 : index
    %c8_41 = arith.constant 8 : index
    %c0_42 = arith.constant 0 : index
    %41 = vector.load %arg3[%c0_40, %c8_41, %c0_42] : memref<1x72x4xf32, #tpu.memory_space<vmem>>, vector<1x64x4xf32>
    %42 = vector.shape_cast %41 : vector<1x64x4xf32> to vector<64x4xf32>
    %c7 = arith.constant 7 : index
    %c0_43 = arith.constant 0 : index
    %c0_44 = arith.constant 0 : index
    %43 = vector.load %arg7[%c7, %c0_43, %c0_44] : memref<9x4x8xf32, #tpu.memory_space<vmem>>, vector<1x4x8xf32>
    %44 = vector.shape_cast %43 : vector<1x4x8xf32> to vector<4x8xf32>
    %cst_45 = arith.constant dense<0.000000e+00> : vector<64x8xf32>
    %45 = tpu.matmul %42, %44, %cst_45 {dimension_numbers = #tpu.dot_dimension_numbers<[1], [0], [0], [1], [0, 0, 1, 1], [], []>} : vector<64x4xf32>, vector<4x8xf32>, vector<64x8xf32> -> vector<64x8xf32>
    %46 = arith.addf %40, %45 : vector<64x8xf32>
    %c0_46 = arith.constant 0 : index
    %c8_47 = arith.constant 8 : index
    %c0_48 = arith.constant 0 : index
    %47 = vector.load %arg2[%c0_46, %c8_47, %c0_48] : memref<1x72x4xf32, #tpu.memory_space<vmem>>, vector<1x64x4xf32>
    %48 = vector.shape_cast %47 : vector<1x64x4xf32> to vector<64x4xf32>
    %c8_49 = arith.constant 8 : index
    %c0_50 = arith.constant 0 : index
    %c0_51 = arith.constant 0 : index
    %49 = vector.load %arg7[%c8_49, %c0_50, %c0_51] : memref<9x4x8xf32, #tpu.memory_space<vmem>>, vector<1x4x8xf32>
    %50 = vector.shape_cast %49 : vector<1x4x8xf32> to vector<4x8xf32>
    %cst_52 = arith.constant dense<0.000000e+00> : vector<64x8xf32>
    %51 = tpu.matmul %48, %50, %cst_52 {dimension_numbers = #tpu.dot_dimension_numbers<[1], [0], [0], [1], [0, 0, 1, 1], [], []>} : vector<64x4xf32>, vector<4x8xf32>, vector<64x8xf32> -> vector<64x8xf32>
    %52 = arith.addf %46, %51 : vector<64x8xf32>
    %cst_53 = arith.constant dense<0.000000e+00> : vector<8xf32>
    %53 = vector.multi_reduction <add>, %52, %cst_53 [0] : vector<64x8xf32> to vector<8xf32>
    %54 = vector.shape_cast %53 : vector<8xf32> to vector<1x8xf32>
    %c0_54 = arith.constant 0 : index
    %c0_55 = arith.constant 0 : index
    %c0_56 = arith.constant 0 : index
    %55 = vector.load %arg10[%c0_54, %c0_55, %c0_56] : memref<1x2x8xf32, #tpu.memory_space<vmem>>, vector<1x1x8xf32>
    %56 = vector.shape_cast %55 : vector<1x1x8xf32> to vector<1x8xf32>
    %57 = vector.shape_cast %54 : vector<1x8xf32> to vector<1x1x8xf32>
    tpu.vector_store %arg10[%c0_54, %c0_55, %c0_56], %57 {strides = array<i32>} : memref<1x2x8xf32, #tpu.memory_space<vmem>>, vector<1x1x8xf32>,
    %58 = arith.mulf %52, %52 : vector<64x8xf32>
    %cst_57 = arith.constant dense<0.000000e+00> : vector<8xf32>
    %59 = vector.multi_reduction <add>, %58, %cst_57 [0] : vector<64x8xf32> to vector<8xf32>
    %60 = vector.shape_cast %59 : vector<8xf32> to vector<1x8xf32>
    %c0_58 = arith.constant 0 : index
    %c1_59 = arith.constant 1 : index
    %c0_60 = arith.constant 0 : index
    %61 = vector.load %arg10[%c0_58, %c1_59, %c0_60] : memref<1x2x8xf32, #tpu.memory_space<vmem>>, vector<1x1x8xf32>
    %62 = vector.shape_cast %61 : vector<1x1x8xf32> to vector<1x8xf32>
    %63 = vector.shape_cast %60 : vector<1x8xf32> to vector<1x1x8xf32>
    tpu.vector_store %arg10[%c0_58, %c1_59, %c0_60], %63 {strides = array<i32>} : memref<1x2x8xf32, #tpu.memory_space<vmem>>, vector<1x1x8xf32>,
    %c0_61 = arith.constant 0 : index
    %c0_62 = arith.constant 0 : index
    %64 = vector.load %arg8[%c0_61, %c0_62] : memref<1x8xf32, #tpu.memory_space<vmem>>, vector<1x8xf32>
    %65 = vector.broadcast %64 : vector<1x8xf32> to vector<64x8xf32>
    %66 = arith.addf %52, %65 : vector<64x8xf32>
    %c0_63 = arith.constant 0 : index
    %c0_64 = arith.constant 0 : index
    %c0_65 = arith.constant 0 : index
    %67 = vector.load %arg9[%c0_63, %c0_64, %c0_65] : memref<1x64x8xf32, #tpu.memory_space<vmem>>, vector<1x64x8xf32>
    %68 = vector.shape_cast %67 : vector<1x64x8xf32> to vector<64x8xf32>
    %69 = vector.shape_cast %66 : vector<64x8xf32> to vector<1x64x8xf32>
    tpu.vector_store %arg9[%c0_63, %c0_64, %c0_65], %69 {strides = array<i32>} : memref<1x64x8xf32, #tpu.memory_space<vmem>>, vector<1x64x8xf32>,
    return
  }
  func.func @transform_0(%arg0: i32) -> (i32, i32, i32) {
    %c0_i32 = arith.constant 0 : i32
    %c0_i32_0 = arith.constant 0 : i32
    %c0_i32_1 = arith.constant 0 : i32
    return %arg0, %c0_i32, %c0_i32_0 : i32, i32, i32
  }
  func.func @transform_1(%arg0: i32) -> (i32, i32, i32) {
    %c0_i32 = arith.constant 0 : i32
    %c0_i32_0 = arith.constant 0 : i32
    %c0_i32_1 = arith.constant 0 : i32
    return %arg0, %c0_i32, %c0_i32_0 : i32, i32, i32
  }
  func.func @transform_2(%arg0: i32) -> (i32, i32, i32) {
    %c0_i32 = arith.constant 0 : i32
    %c0_i32_0 = arith.constant 0 : i32
    %c0_i32_1 = arith.constant 0 : i32
    return %arg0, %c0_i32, %c0_i32_0 : i32, i32, i32
  }
  func.func @transform_3(%arg0: i32) -> (i32, i32, i32) {
    %c0_i32 = arith.constant 0 : i32
    %c0_i32_0 = arith.constant 0 : i32
    %c0_i32_1 = arith.constant 0 : i32
    return %arg0, %c0_i32, %c0_i32_0 : i32, i32, i32
  }
  func.func @transform_4(%arg0: i32) -> (i32, i32, i32) {
    %c0_i32 = arith.constant 0 : i32
    %c0_i32_0 = arith.constant 0 : i32
    %c0_i32_1 = arith.constant 0 : i32
    return %arg0, %c0_i32, %c0_i32_0 : i32, i32, i32
  }
  func.func @transform_5(%arg0: i32) -> (i32, i32, i32) {
    %c0_i32 = arith.constant 0 : i32
    %c0_i32_0 = arith.constant 0 : i32
    %c0_i32_1 = arith.constant 0 : i32
    return %arg0, %c0_i32, %c0_i32_0 : i32, i32, i32
  }
  func.func @transform_6(%arg0: i32) -> (i32, i32, i32) {
    %c0_i32 = arith.constant 0 : i32
    %c0_i32_0 = arith.constant 0 : i32
    %c0_i32_1 = arith.constant 0 : i32
    %c0_i32_2 = arith.constant 0 : i32
    return %c0_i32, %c0_i32_0, %c0_i32_1 : i32, i32, i32
  }
  func.func @transform_7(%arg0: i32) -> (i32, i32) {
    %c0_i32 = arith.constant 0 : i32
    %c0_i32_0 = arith.constant 0 : i32
    %c0_i32_1 = arith.constant 0 : i32
    return %c0_i32, %c0_i32_0 : i32, i32
  }
  func.func @transform_8(%arg0: i32) -> (i32, i32, i32) {
    %c0_i32 = arith.constant 0 : i32
    %c0_i32_0 = arith.constant 0 : i32
    %c0_i32_1 = arith.constant 0 : i32
    return %arg0, %c0_i32, %c0_i32_0 : i32, i32, i32
  }
  func.func @transform_9(%arg0: i32) -> (i32, i32, i32) {
    %c0_i32 = arith.constant 0 : i32
    %c0_i32_0 = arith.constant 0 : i32
    %c0_i32_1 = arith.constant 0 : i32
    return %arg0, %c0_i32, %c0_i32_0 : i32, i32, i32
  }
}

</mosaic_0001>

<bundles_post_ra>
// kernel: downsample_forward.1
= control target key start
LH: loop header
LB: loop body
LE: loop exit
PB: predicated region body
PF: predicated region fallthrough
CT: control target
= control target key end

     0   :  { %s1606_s30 = smov 0   ;;  %s1975_s0 = inlined_call_operand.vmem [shape: f32[2,72,4], index: 0, kind: input, shape index: {}]   ;;  %s1976_s1 = inlined_call_operand.vmem [shape: f32[2,72,4], index: 1, kind: input, shape index: {}]   ;;  %s1977_s2 = inlined_call_operand.vmem [shape: f32[2,72,4], index: 2, kind: input, shape index: {}]   ;;  %s1978_s3 = inlined_call_operand.vmem [shape: f32[2,64,4], index: 3, kind: input, shape index: {}]   ;;  %s1979_s4 = inlined_call_operand.vmem [shape: f32[2,64,4], index: 4, kind: input, shape index: {}]   ;;  %s1980_s5 = inlined_call_operand.vmem [shape: f32[2,64,4], index: 5, kind: input, shape index: {}]   ;;  %s1981_s6 = inlined_call_operand.vmem [shape: f32[9,4,8], index: 6, kind: input, shape index: {}]   ;;  %s1982_s7 = inlined_call_operand.vmem [shape: f32[1,8], index: 7, kind: input, shape index: {}]   ;;  %s1983_s8 = inlined_call_operand.vmem [shape: f32[2,64,8], index: 8, kind: output, shape index: {0}]   ;;  %s1984_s9 = inlined_call_operand.vmem [shape: f32[2,2,8], index: 9, kind: output, shape index: {1}]  }
   0x1 LB: > { %s1423_s10 = sadd.s32 4294967295, %s1554_s30   ;;  %p1427_p0 = scmp.ge.s32.totalorder %s1554_s30, 1  ;;  %s1554_s30 = sphi %s1606_s30, %s20_s30  }
   0x2   : > { %p340_p1 = scmp.lt.s32.totalorder %s1554_s30, 3 }
   0x4   : > { %p341_p2 = pnand %p1427_p0, %p340_p1 }
   0x5   : > { %p405_p3 = scmp.lt.s32.totalorder (!%p341_p2), %s1423_s10, 1 }
   0x6   : > { %344 = sbr.rel (%p341_p2) target bundleno = 309 (0x135), region = 52 }
   0xb   : > { %v1440_v0 = vld [vmem:[%s1981_s6 + $0x4] sm:$0xf]  ;;  %vm488_vm0 = vcmask 1043456   ;;  %v1459_v1 = vld [vmem:[%s1981_s6 + $0x8] sm:$0xf]  ;;  %s1986_s10 = smov (!%p405_p3, %s1423_s10), 1 }
   0xc   : > { %1535 = vmatpush.msk.msra.mxu1 %vm488_vm0, %v1440_v0  ;;  %1536 = vmatpush.msk.msra.mxu2 %vm488_vm0, %v1440_v0  ;;  %v1469_v2 = vld [vmem:[%s1981_s6 + $0xc] sm:$0xf]  ;;  %v452_v3 = vld [vmem:[%s1981_s6] sm:$0xf]  ;;  %v1479_v4 = vld [vmem:[%s1981_s6 + $0x10] sm:$0xf] }
   0xd   : > { %1537 = vmatpush.msk.msra.mxu3 %vm488_vm0, %v1440_v0  ;;  %s1638_s21 = smul.u32 72, %s1986_s10  ;;  %1441 = vmatpush.msk.msra.mxu0 %vm488_vm0, %v1440_v0  ;;  %vm463_vm1 = vcmask 31744   ;;  %v1499_v5 = vld [vmem:[%s1981_s6 + $0x18] sm:$0xf]  ;;  %v1509_v6 = vld [vmem:[%s1981_s6 + $0x1c] sm:$0xf] }
   0xe   : > { %1460 = vmatpush.msk.msrb.mxu2 %vm488_vm0, %v1459_v1  ;;  %1450 = vmatpush.msk.msrb.mxu1 %vm488_vm0, %v452_v3  ;;  %v1489_v11 = vld [vmem:[%s1981_s6 + $0x14] sm:$0xf]  ;;  %v1519_v12 = vld [vmem:[%s1981_s6 + $0x20] sm:$0xf]  ;;  %s1698_s14 = sshll.u32 %s1986_s10, 6  ;;  %vm1203_vm2 = vcmask 64512  }
   0xf   : > { %1470 = vmatpush.msk.msrb.mxu3 %vm488_vm0, %v1469_v2  ;;  %1480 = vmatpush.msk.msrb.mxu0 %vm488_vm0, %v1479_v4  ;;  %s1646_s24 = scalar_lea.vmem %s1977_s2, %s1638_s21  ;;  %s1708_s17 = scalar_lea.vmem %s1975_s0, %s1638_s21  ;;  %vm1225_vm3 = vcmask 57344  }
  0x10   : > { %v1655_v7 = vld [vmem:[%s1646_s24 + $0x10] sm:$0xff]  ;;  %v1658_v8 = vld [vmem:[%s1646_s24 + $0x20] sm:$0xff]  ;;  %v1682_v13 = vld [vmem:[%s1646_s24 + $0x18] sm:$0xff]  ;;  %s1714_s20 = scalar_lea.vmem %s1976_s1, %s1638_s21  ;;  %s1720_s25 = scalar_lea.vmem %s1978_s3, %s1698_s14 }
  0x11   : > { %v1661_v9 = vld [vmem:[%s1646_s24 + $0x30] sm:$0xff]  ;;  %1444 = vmatmul.msk.f32.vlgmr.msra.gmra.mxu1 %vm463_vm1, %v1655_v7  ;;  %1446 = vmatmul.msk.f32.vlgmr.msra.gmra.mxu2 %vm463_vm1, %v1658_v8  ;;  %v453_v10 = vld [vmem:[%s1646_s24] sm:$0xff]  ;;  %v1685_v14 = vld [vmem:[%s1646_s24 + $0x28] sm:$0xff]  ;;  %s1726_s28 = scalar_lea.vmem %s1980_s5, %s1698_s14  ;;  %s1796_s11 = scalar_lea.vmem %s1979_s4, %s1698_s14 }
  0x12   : > { %1448 = vmatmul.msk.f32.vlgmr.msra.gmra.mxu3 %vm463_vm1, %v1661_v9  ;;  %1442 = vmatmul.msk.f32.vlgmr.msra.gmra.mxu0 %vm463_vm1, %v453_v10  ;;  %v1688_v15 = vld [vmem:[%s1646_s24 + $0x38] sm:$0xff]  ;;  %v1691_v16 = vld [vmem:[%s1646_s24 + $0x8] sm:$0xff]  ;;  %v444_v17 = vld [vmem:[%s1708_s17] sm:$0xff]  ;;  %s1904_s16 = scalar_lea.vmem %s1983_s8, %s1698_s14  ;;  %s1439_s14 = sshll.u32 %s1986_s10, 1 }
  0x13   : > { %1500 = vmatpush.msk.msra.mxu2 %vm488_vm0, %v1499_v5  ;;  %1510 = vmatpush.msk.msra.mxu3 %vm488_vm0, %v1509_v6  ;;  %v601_v18 = vld [vmem:[%s1714_s20] sm:$0xff]  ;;  %v445_v21 = vld [vmem:[%s1708_s17 + $0x8] sm:$0xff]  ;;  %v446_v25 = vld [vmem:[%s1708_s17 + $0x10] sm:$0xff]  ;;  %s443_s19 = scalar_lea.vmem %s1984_s9, %s1439_s14 }
  0x14   : > { %1490 = vmatpush.msk.msra.mxu1 %vm488_vm0, %v1489_v11  ;;  %1520 = vmatpush.msk.msra.mxu0 %vm488_vm0, %v1519_v12  ;;  %v687_v19 = vld [vmem:[%s1720_s25] sm:$0xff]  ;;  %v602_v22 = vld [vmem:[%s1714_s20 + $0x8] sm:$0xff]  ;;  %v603_v26 = vld [vmem:[%s1714_s20 + $0x10] sm:$0xff] }
  0x15   : > { %v773_v20 = vld [vmem:[%s1726_s28] sm:$0xff]  ;;  %v688_v23 = vld [vmem:[%s1720_s25 + $0x8] sm:$0xff]  ;;  %v689_v27 = vld [vmem:[%s1720_s25 + $0x10] sm:$0xff] }
  0x16   : > { %v774_v24 = vld [vmem:[%s1726_s28 + $0x8] sm:$0xff]  ;;  %v775_v28 = vld [vmem:[%s1726_s28 + $0x10] sm:$0xff]  ;;  %v447_v29 = vld [vmem:[%s1708_s17 + $0x18] sm:$0xff] }
  0x17   : > { %v604_v30 = vld [vmem:[%s1714_s20 + $0x18] sm:$0xff]  ;;  %v448_v33 = vld [vmem:[%s1708_s17 + $0x20] sm:$0xff]  ;;  %v449_v37 = vld [vmem:[%s1708_s17 + $0x28] sm:$0xff] }
  0x18   : > { %v690_v31 = vld [vmem:[%s1720_s25 + $0x18] sm:$0xff]  ;;  %v605_v34 = vld [vmem:[%s1714_s20 + $0x20] sm:$0xff]  ;;  %v606_v38 = vld [vmem:[%s1714_s20 + $0x28] sm:$0xff] }
  0x19   : > { %1445 = vmatmul.msk.f32.gmra.mxu1 %vm463_vm1, %v1682_v13  ;;  %1447 = vmatmul.msk.f32.gmra.mxu2 %vm463_vm1, %v1685_v14  ;;  %v776_v32 = vld [vmem:[%s1726_s28 + $0x18] sm:$0xff]  ;;  %v691_v35 = vld [vmem:[%s1720_s25 + $0x20] sm:$0xff]  ;;  %v692_v39 = vld [vmem:[%s1720_s25 + $0x28] sm:$0xff] }
  0x1a   : > { %1449 = vmatmul.msk.f32.gmra.mxu3 %vm463_vm1, %v1688_v15  ;;  %1443 = vmatmul.msk.f32.gmra.mxu0 %vm463_vm1, %v1691_v16  ;;  %v777_v36 = vld [vmem:[%s1726_s28 + $0x20] sm:$0xff]  ;;  %v778_v40 = vld [vmem:[%s1726_s28 + $0x28] sm:$0xff]  ;;  %v450_v41 = vld [vmem:[%s1708_s17 + $0x30] sm:$0xff] }
  0x1b   : > { %v607_v42 = vld [vmem:[%s1714_s20 + $0x30] sm:$0xff]  ;;  %v451_v45 = vld [vmem:[%s1708_s17 + $0x38] sm:$0xff]  ;;  %v859_v49 = vld [vmem:[%s1796_s11] sm:$0xff] }
  0x1c   : > { %v693_v43 = vld [vmem:[%s1720_s25 + $0x30] sm:$0xff]  ;;  %v608_v46 = vld [vmem:[%s1714_s20 + $0x38] sm:$0xff]  ;;  %v860_v50 = vld [vmem:[%s1796_s11 + $0x8] sm:$0xff] }
  0x1d   : > { %v779_v44 = vld [vmem:[%s1726_s28 + $0x30] sm:$0xff]  ;;  %v694_v47 = vld [vmem:[%s1720_s25 + $0x38] sm:$0xff]  ;;  %v863_v53 = vld [vmem:[%s1796_s11 + $0x20] sm:$0xff] }
  0x1e   : > { %v780_v48 = vld [vmem:[%s1726_s28 + $0x38] sm:$0xff]  ;;  %v861_v51 = vld [vmem:[%s1796_s11 + $0x10] sm:$0xff]  ;;  %v864_v54 = vld [vmem:[%s1796_s11 + $0x28] sm:$0xff] }
  0x1f   : > { %v862_v52 = vld [vmem:[%s1796_s11 + $0x18] sm:$0xff]  ;;  %v865_v56 = vld [vmem:[%s1796_s11 + $0x30] sm:$0xff]  ;;  %v952_v62 = vld [vmem:[%s1708_s17 + $0x40] sm:$0xff] }
  0x20   : > { %v866_v61 = vld [vmem:[%s1796_s11 + $0x38] sm:$0xff]  ;;  %v1038_v63 = vld [vmem:[%s1646_s24 + $0x40] sm:$0xff] }
  0x21   : > { %1451 = vmatmul.msk.f32.vlgmr.msrb.gmra.mxu1 %vm463_vm1, %v444_v17  ;;  %1461 = vmatmul.msk.f32.vlgmr.msrb.gmra.mxu2 %vm463_vm1, %v601_v18  ;;  %v1124_v1 = vld [vmem:[%s1714_s20 + $0x40] sm:$0xff] }
  0x22   : > { %1471 = vmatmul.msk.f32.vlgmr.msrb.gmra.mxu3 %vm463_vm1, %v687_v19  ;;  %1481 = vmatmul.msk.f32.vlgmr.msrb.gmra.mxu0 %vm463_vm1, %v773_v20 }
  0x29   : > { %1452 = vmatmul.msk.f32.gmra.mxu1 %vm463_vm1, %v445_v21  ;;  %1462 = vmatmul.msk.f32.gmra.mxu2 %vm463_vm1, %v602_v22 }
  0x2a   : > { %1472 = vmatmul.msk.f32.gmra.mxu3 %vm463_vm1, %v688_v23  ;;  %1482 = vmatmul.msk.f32.gmra.mxu0 %vm463_vm1, %v774_v24 }
  0x31   : > { %1453 = vmatmul.msk.f32.gmra.mxu1 %vm463_vm1, %v446_v25  ;;  %1463 = vmatmul.msk.f32.gmra.mxu2 %vm463_vm1, %v603_v26 }
  0x32   : > { %1473 = vmatmul.msk.f32.gmra.mxu3 %vm463_vm1, %v689_v27  ;;  %1483 = vmatmul.msk.f32.gmra.mxu0 %vm463_vm1, %v775_v28 }
  0x39   : > { %1454 = vmatmul.msk.f32.gmra.mxu1 %vm463_vm1, %v447_v29  ;;  %1464 = vmatmul.msk.f32.gmra.mxu2 %vm463_vm1, %v604_v30 }
  0x3a   : > { %1474 = vmatmul.msk.f32.gmra.mxu3 %vm463_vm1, %v690_v31  ;;  %1484 = vmatmul.msk.f32.gmra.mxu0 %vm463_vm1, %v776_v32 }
  0x41   : > { %1455 = vmatmul.msk.f32.gmra.mxu1 %vm463_vm1, %v448_v33  ;;  %1465 = vmatmul.msk.f32.gmra.mxu2 %vm463_vm1, %v605_v34 }
  0x42   : > { %1475 = vmatmul.msk.f32.gmra.mxu3 %vm463_vm1, %v691_v35  ;;  %1485 = vmatmul.msk.f32.gmra.mxu0 %vm463_vm1, %v777_v36 }
  0x49   : > { %1456 = vmatmul.msk.f32.gmra.mxu1 %vm463_vm1, %v449_v37  ;;  %1466 = vmatmul.msk.f32.gmra.mxu2 %vm463_vm1, %v606_v38 }
  0x4a   : > { %1476 = vmatmul.msk.f32.gmra.mxu3 %vm463_vm1, %v692_v39  ;;  %1486 = vmatmul.msk.f32.gmra.mxu0 %vm463_vm1, %v778_v40 }
  0x51   : > { %1457 = vmatmul.msk.f32.gmra.mxu1 %vm463_vm1, %v450_v41  ;;  %1467 = vmatmul.msk.f32.gmra.mxu2 %vm463_vm1, %v607_v42 }
  0x52   : > { %1477 = vmatmul.msk.f32.gmra.mxu3 %vm463_vm1, %v693_v43  ;;  %1487 = vmatmul.msk.f32.gmra.mxu0 %vm463_vm1, %v779_v44 }
  0x59   : > { %1458 = vmatmul.msk.f32.gmra.mxu1 %vm463_vm1, %v451_v45  ;;  %1468 = vmatmul.msk.f32.gmra.mxu2 %vm463_vm1, %v608_v46 }
  0x5a   : > { %1478 = vmatmul.msk.f32.gmra.mxu3 %vm463_vm1, %v694_v47  ;;  %1488 = vmatmul.msk.f32.gmra.mxu0 %vm463_vm1, %v780_v48 }
  0x61   : > { %1491 = vmatmul.msk.f32.vlgmr.msra.gmra.mxu1 %vm463_vm1, %v859_v49  ;;  %1501 = vmatmul.msk.f32.vlgmr.msra.gmra.mxu2 %vm463_vm1, %v445_v21 }
  0x62   : > { %1511 = vmatmul.msk.f32.vlgmr.msra.gmra.mxu3 %vm463_vm1, %v1691_v16  ;;  %1521 = vmatmul.msk.f32.vlgmr.msra.gmra.mxu0 %vm463_vm1, %v602_v22 }
  0x69   : > { %1492 = vmatmul.msk.f32.gmra.mxu1 %vm463_vm1, %v860_v50  ;;  %1502 = vmatmul.msk.f32.gmra.mxu2 %vm463_vm1, %v446_v25 }
  0x6a   : > { %1512 = vmatmul.msk.f32.gmra.mxu3 %vm463_vm1, %v1655_v7  ;;  %1522 = vmatmul.msk.f32.gmra.mxu0 %vm463_vm1, %v603_v26 }
  0x71   : > { %1493 = vmatmul.msk.f32.gmra.mxu1 %vm463_vm1, %v861_v51  ;;  %1503 = vmatmul.msk.f32.gmra.mxu2 %vm463_vm1, %v447_v29 }
  0x72   : > { %1513 = vmatmul.msk.f32.gmra.mxu3 %vm463_vm1, %v1682_v13  ;;  %1523 = vmatmul.msk.f32.gmra.mxu0 %vm463_vm1, %v604_v30 }
  0x79   : > { %1494 = vmatmul.msk.f32.gmra.mxu1 %vm463_vm1, %v862_v52  ;;  %1504 = vmatmul.msk.f32.gmra.mxu2 %vm463_vm1, %v448_v33  ;;  %v1898_v52 = vld [vmem:[%s1982_s7] ss:$0 sm:$0xff] }
  0x7a   : > { %1514 = vmatmul.msk.f32.gmra.mxu3 %vm463_vm1, %v1658_v8  ;;  %1524 = vmatmul.msk.f32.gmra.mxu0 %vm463_vm1, %v605_v34 }
  0x81   : > { %1495 = vmatmul.msk.f32.gmra.mxu1 %vm463_vm1, %v863_v53  ;;  %1505 = vmatmul.msk.f32.gmra.mxu2 %vm463_vm1, %v449_v37 }
  0x82   : > { %1515 = vmatmul.msk.f32.gmra.mxu3 %vm463_vm1, %v1685_v14  ;;  %1525 = vmatmul.msk.f32.gmra.mxu0 %vm463_vm1, %v606_v38 }
  0x89   : > { %1496 = vmatmul.msk.f32.gmra.mxu1 %vm463_vm1, %v864_v54  ;;  %1506 = vmatmul.msk.f32.gmra.mxu2 %vm463_vm1, %v450_v41 }
  0x8a   : > { %1516 = vmatmul.msk.f32.gmra.mxu3 %vm463_vm1, %v1661_v9  ;;  %1526 = vmatmul.msk.f32.gmra.mxu0 %vm463_vm1, %v607_v42 }
  0x8e   : > { %v1834_v55 = vpop.f32.mrf.mxu1 }
  0x8f   : > { %v509_v57 = vpop.f32.mrf.mxu0 }
  0x91   : > { %1497 = vmatmul.msk.f32.gmra.mxu1 %vm463_vm1, %v865_v56  ;;  %1507 = vmatmul.msk.f32.gmra.mxu2 %vm463_vm1, %v451_v45 }
  0x92   : > { %1517 = vmatmul.msk.f32.gmra.mxu3 %vm463_vm1, %v1688_v15  ;;  %1527 = vmatmul.msk.f32.gmra.mxu0 %vm463_vm1, %v608_v46 }
  0x94   : > { %v1842_v58 = vpop.f32.mrf.mxu2 }
  0x95   : > { %v1844_v59 = vpop.f32.mrf.mxu3 }
  0x96   : > { %v1846_v60 = vpop.f32.mrf.mxu1 }
  0x97   : > { %v512_v0 = vpop.f32.mrf.mxu0 }
  0x99   : > { %1498 = vmatmul.msk.f32.gmra.mxu1 %vm463_vm1, %v866_v61  ;;  %1508 = vmatmul.msk.f32.gmra.mxu2 %vm463_vm1, %v952_v62 }
  0x9a   : > { %1518 = vmatmul.msk.f32.gmra.mxu3 %vm463_vm1, %v1038_v63  ;;  %1528 = vmatmul.msk.f32.gmra.mxu0 %vm463_vm1, %v1124_v1 }
  0x9c   : > { %v1856_v2 = vpop.f32.mrf.mxu2 }
  0x9d   : > { %v1858_v3 = vpop.f32.mrf.mxu3 }
  0x9e   : > { %v577_v4 = vpop.f32.mrf.mxu1 }
  0x9f   : > { %v827_v5 = vpop.f32.mrf.mxu0  ;;  %v578_v33 = vadd.f32 %v577_v4, %v509_v57 }
  0xa4   : > { %v655_v6 = vpop.f32.mrf.mxu2 }
  0xa5   : > { %v741_v7 = vpop.f32.mrf.mxu3  ;;  %v679_v35 = vadd.f32 %v655_v6, %v578_v33 }
  0xa6   : > { %v580_v8 = vpop.f32.mrf.mxu1 }
  0xa7   : > { %v830_v9 = vpop.f32.mrf.mxu0  ;;  %v765_v37 = vadd.f32 %v741_v7, %v679_v35  ;;  %v581_v40 = vadd.f32 %v580_v8, %v512_v0 }
  0xa9   : > { %v851_v42 = vadd.f32 %v827_v5, %v765_v37 }
  0xac   : > { %v658_v10 = vpop.f32.mrf.mxu2 }
  0xad   : > { %v744_v11 = vpop.f32.mrf.mxu3  ;;  %v680_v43 = vadd.f32 %v658_v10, %v581_v40 }
  0xae   : > { %v583_v12 = vpop.f32.mrf.mxu1 }
  0xaf   : > { %v833_v13 = vpop.f32.mrf.mxu0  ;;  %v766_v46 = vadd.f32 %v744_v11, %v680_v43  ;;  %v584_v50 = vadd.f32 %v583_v12, %v1834_v55 }
  0xb1   : > { %v852_v54 = vadd.f32 %v830_v9, %v766_v46 }
  0xb4   : > { %v661_v14 = vpop.f32.mrf.mxu2 }
  0xb5   : > { %v747_v15 = vpop.f32.mrf.mxu3  ;;  %v681_v56 = vadd.f32 %v661_v14, %v584_v50 }
  0xb6   : > { %v586_v16 = vpop.f32.mrf.mxu1 }
  0xb7   : > { %v1860_v17 = vpop.f32.mrf.mxu0  ;;  %v767_v63 = vadd.f32 %v747_v15, %v681_v56  ;;  %v587_v5 = vadd.f32 %v586_v16, %v1846_v60 }
  0xb9   : > { %v853_v8 = vadd.f32 %v833_v13, %v767_v63 }
  0xbc   : > { %v664_v18 = vpop.f32.mrf.mxu2 }
  0xbd   : > { %v750_v19 = vpop.f32.mrf.mxu3  ;;  %v682_v9 = vadd.f32 %v664_v18, %v587_v5 }
  0xbe   : > { %v1862_v20 = vpop.f32.mrf.mxu1 }
  0xbf   : > { %v1864_v21 = vpop.f32.mrf.mxu0  ;;  %v768_v40 = vadd.f32 %v750_v19, %v682_v9  ;;  %v590_v43 = vadd.f32 %v1862_v20, %v1842_v58 }
  0xc1   : > { %v854_v46 = vadd.f32 %v1860_v17, %v768_v40 }
  0xc4   : > { %v1866_v22 = vpop.f32.mrf.mxu2 }
  0xc5   : > { %v1868_v23 = vpop.f32.mrf.mxu3  ;;  %v683_v19 = vadd.f32 %v1866_v22, %v590_v43 }
  0xc6   : > { %v1870_v24 = vpop.f32.mrf.mxu1 }
  0xc7   : > { %v1872_v25 = vpop.f32.mrf.mxu0  ;;  %v769_v56 = vadd.f32 %v1868_v23, %v683_v19 }
  0xc9   : > { %v855_v63 = vadd.f32 %v1864_v21, %v769_v56 }
  0xcc   : > { %v1874_v26 = vpop.f32.mrf.mxu2 }
  0xcd   : > { %v1876_v27 = vpop.f32.mrf.mxu3 }
  0xce   : > { %v1878_v28 = vpop.f32.mrf.mxu1 }
  0xcf   : > { %v1880_v29 = vpop.f32.mrf.mxu0 }
  0xd4   : > { %v1882_v30 = vpop.f32.mrf.mxu2 }
  0xd5   : > { %v1884_v31 = vpop.f32.mrf.mxu3 }
  0xd6   : > { %v1886_v32 = vpop.f32.mrf.mxu1 }
  0xd7   : > { %v1888_v34 = vpop.f32.mrf.mxu0 }
  0xdc   : > { %v1890_v36 = vpop.f32.mrf.mxu2 }
  0xdd   : > { %v1892_v38 = vpop.f32.mrf.mxu3 }
  0xde   : > { %v913_v39 = vpop.f32.mrf.mxu1 }
  0xdf   : > { %v1171_v41 = vpop.f32.mrf.mxu0  ;;  %v937_v44 = vadd.f32 %v913_v39, %v851_v42 }
  0xe4   : > { %v999_v45 = vpop.f32.mrf.mxu2 }
  0xe5   : > { %v1023_v47 = vadd.f32 %v999_v45, %v937_v44  ;;  %v1085_v48 = vpop.f32.mrf.mxu3 }
  0xe6   : > { %v916_v49 = vpop.f32.mrf.mxu1 }
  0xe7   : > { %v1109_v51 = vadd.f32 %v1085_v48, %v1023_v47  ;;  %v1174_v53 = vpop.f32.mrf.mxu0  ;;  %v938_v61 = vadd.f32 %v916_v49, %v852_v54 }
  0xe9   : > { %v1195_v57 = vadd.f32 %v1171_v41, %v1109_v51 }
  0xeb   : > { %v1261_v62 = vadd.f32 %v1898_v52, %v1195_v57  ;;  %v1227_v10 = vmul.f32 %v1195_v57, %v1195_v57  ;;  %v1204_v12 = vsel %vm1203_vm2, %v1195_v57, 0.0 }
  0xec   : > { %v1002_v55 = vpop.f32.mrf.mxu2 }
  0xed   : > { %1269 = vst.msk [vmem:[%s1904_s16] sm:$0xff] %vm1203_vm2, %v1261_v62  ;;  %v1024_v0 = vadd.f32 %v1002_v55, %v938_v61  ;;  %v1088_v1 = vpop.f32.mrf.mxu3  ;;  %v1235_v60 = vsel %vm1203_vm2, %v1227_v10, 0.0  ;;  %v593_v61 = vadd.f32 %v1870_v24, %v1856_v2 }
  0xee   : > { %v919_v4 = vpop.f32.mrf.mxu1 }
  0xef   : > { %v1110_v6 = vadd.f32 %v1088_v1, %v1024_v0  ;;  %v1177_v7 = vpop.f32.mrf.mxu0  ;;  %v939_v14 = vadd.f32 %v919_v4, %v853_v8  ;;  %v684_v0 = vadd.f32 %v1874_v26, %v593_v61 }
  0xf1   : > { %v1196_v11 = vadd.f32 %v1174_v53, %v1110_v6  ;;  %v770_v9 = vadd.f32 %v1876_v27, %v684_v0 }
  0xf3   : > { %v1205_v33 = vsel %vm1203_vm2, %v1196_v11, 0.0  ;;  %v1228_v15 = vmul.f32 %v1196_v11, %v1196_v11  ;;  %v1262_v35 = vadd.f32 %v1898_v52, %v1196_v11  ;;  %v596_v11 = vadd.f32 %v1878_v28, %v1844_v59 }
  0xf4   : > { %v1206_v37 = vadd.f32 %v1205_v33, %v1204_v12  ;;  %v1005_v39 = vpop.f32.mrf.mxu2 }
  0xf5   : > { %v1236_v16 = vsel %vm1203_vm2, %v1228_v15, 0.0  ;;  %1270 = vst.msk [vmem:[%s1904_s16 + $0x8] sm:$0xff] %vm1203_vm2, %v1262_v35  ;;  %v1025_v13 = vadd.f32 %v1005_v39, %v939_v14  ;;  %v1091_v18 = vpop.f32.mrf.mxu3  ;;  %v856_v14 = vadd.f32 %v1872_v25, %v770_v9  ;;  %v685_v33 = vadd.f32 %v1882_v30, %v596_v11 }
  0xf6   : > { %v1237_v41 = vadd.f32 %v1236_v16, %v1235_v60  ;;  %v922_v42 = vpop.f32.mrf.mxu1 }
  0xf7   : > { %v1111_v44 = vadd.f32 %v1091_v18, %v1025_v13  ;;  %v1180_v45 = vpop.f32.mrf.mxu0  ;;  %v940_v48 = vadd.f32 %v922_v42, %v854_v46  ;;  %v771_v13 = vadd.f32 %v1884_v31, %v685_v33 }
  0xf9   : > { %v1197_v47 = vadd.f32 %v1177_v7, %v1111_v44  ;;  %v857_v43 = vadd.f32 %v1880_v29, %v771_v13 }
  0xfb   : > { %v1207_v49 = vsel %vm1203_vm2, %v1197_v47, 0.0  ;;  %v1229_v50 = vmul.f32 %v1197_v47, %v1197_v47  ;;  %v1263_v51 = vadd.f32 %v1898_v52, %v1197_v47 }
  0xfc   : > { %v1208_v53 = vadd.f32 %v1207_v49, %v1206_v37  ;;  %v1008_v54 = vpop.f32.mrf.mxu2 }
  0xfd   : > { %v1238_v57 = vsel %vm1203_vm2, %v1229_v50, 0.0  ;;  %1271 = vst.msk [vmem:[%s1904_s16 + $0x10] sm:$0xff] %vm1203_vm2, %v1263_v51  ;;  %v1026_v58 = vadd.f32 %v1008_v54, %v940_v48  ;;  %v1094_v20 = vpop.f32.mrf.mxu3 }
  0xfe   : > { %v1239_v17 = vadd.f32 %v1238_v57, %v1237_v41  ;;  %v925_v22 = vpop.f32.mrf.mxu1  ;;  %v599_v41 = vadd.f32 %v1886_v32, %v1858_v3 }
  0xff   : > { %v1112_v62 = vadd.f32 %v1094_v20, %v1026_v58  ;;  %v1183_v55 = vpop.f32.mrf.mxu0  ;;  %v941_v23 = vadd.f32 %v925_v22, %v855_v63 }
 0x100   : > { %v686_v44 = vadd.f32 %v1890_v36, %v599_v41 }
 0x101   : > { %v1198_v1 = vadd.f32 %v1180_v45, %v1112_v62 }
 0x102   : > { %v772_v51 = vadd.f32 %v1892_v38, %v686_v44 }
 0x103   : > { %v1209_v4 = vsel %vm1203_vm2, %v1198_v1, 0.0  ;;  %v1230_v5 = vmul.f32 %v1198_v1, %v1198_v1  ;;  %v1264_v6 = vadd.f32 %v1898_v52, %v1198_v1 }
 0x104   : > { %v1210_v7 = vadd.f32 %v1209_v4, %v1208_v53  ;;  %v1011_v8 = vpop.f32.mrf.mxu2  ;;  %v858_v56 = vadd.f32 %v1888_v34, %v772_v51 }
 0x105   : > { %v1240_v10 = vsel %vm1203_vm2, %v1230_v5, 0.0  ;;  %1272 = vst.msk [vmem:[%s1904_s16 + $0x18] sm:$0xff] %vm1203_vm2, %v1264_v6  ;;  %v1027_v2 = vadd.f32 %v1011_v8, %v941_v23  ;;  %v1097_v24 = vpop.f32.mrf.mxu3 }
 0x106   : > { %v1241_v21 = vadd.f32 %v1240_v10, %v1239_v17  ;;  %v928_v26 = vpop.f32.mrf.mxu1 }
 0x107   : > { %v1113_v12 = vadd.f32 %v1097_v24, %v1027_v2  ;;  %v1186_v35 = vpop.f32.mrf.mxu0  ;;  %v942_v27 = vadd.f32 %v928_v26, %v856_v14 }
 0x109   : > { %v1199_v15 = vadd.f32 %v1183_v55, %v1113_v12 }
 0x10b   : > { %v1211_v37 = vsel %vm1203_vm2, %v1199_v15, 0.0  ;;  %v1231_v39 = vmul.f32 %v1199_v15, %v1199_v15  ;;  %v1265_v40 = vadd.f32 %v1898_v52, %v1199_v15 }
 0x10c   : > { %v1212_v60 = vadd.f32 %v1211_v37, %v1210_v7  ;;  %v1014_v16 = vpop.f32.mrf.mxu2 }
 0x10d   : > { %v1242_v18 = vsel %vm1203_vm2, %v1231_v39, 0.0  ;;  %1273 = vst.msk [vmem:[%s1904_s16 + $0x20] sm:$0xff] %vm1203_vm2, %v1265_v40  ;;  %v1028_v59 = vadd.f32 %v1014_v16, %v942_v27  ;;  %v1100_v25 = vpop.f32.mrf.mxu3 }
 0x10e   : > { %v1243_v28 = vadd.f32 %v1242_v18, %v1241_v21  ;;  %v931_v30 = vpop.f32.mrf.mxu1 }
 0x10f   : > { %v1114_v42 = vadd.f32 %v1100_v25, %v1028_v59  ;;  %v943_v46 = vadd.f32 %v931_v30, %v857_v43  ;;  %v1189_v50 = vpop.f32.mrf.mxu0 }
 0x111   : > { %v1200_v45 = vadd.f32 %v1186_v35, %v1114_v42 }
 0x113   : > { %v1213_v31 = vsel %vm1203_vm2, %v1200_v45, 0.0  ;;  %v1232_v19 = vmul.f32 %v1200_v45, %v1200_v45  ;;  %v1266_v47 = vadd.f32 %v1898_v52, %v1200_v45 }
 0x114   : > { %v1214_v48 = vadd.f32 %v1213_v31, %v1212_v60  ;;  %v1017_v49 = vpop.f32.mrf.mxu2 }
 0x115   : > { %v1244_v53 = vsel %vm1203_vm2, %v1232_v19, 0.0  ;;  %1274 = vst.msk [vmem:[%s1904_s16 + $0x28] sm:$0xff] %vm1203_vm2, %v1266_v47  ;;  %v1029_v3 = vadd.f32 %v1017_v49, %v943_v46  ;;  %v1103_v29 = vpop.f32.mrf.mxu3 }
 0x116   : > { %v1245_v32 = vadd.f32 %v1244_v53, %v1243_v28  ;;  %v934_v54 = vpop.f32.mrf.mxu1 }
 0x117   : > { %v1115_v36 = vadd.f32 %v1103_v29, %v1029_v3  ;;  %v944_v58 = vadd.f32 %v934_v54, %v858_v56  ;;  %v1192_v1 = vpop.f32.mrf.mxu0 }
 0x119   : > { %v1201_v57 = vadd.f32 %v1189_v50, %v1115_v36 }
 0x11b   : > { %v1215_v20 = vsel %vm1203_vm2, %v1201_v57, 0.0  ;;  %v1233_v17 = vmul.f32 %v1201_v57, %v1201_v57  ;;  %v1267_v22 = vadd.f32 %v1898_v52, %v1201_v57 }
 0x11c   : > { %v1216_v38 = vadd.f32 %v1215_v20, %v1214_v48  ;;  %v1020_v61 = vpop.f32.mrf.mxu2 }
 0x11d   : > { %v1246_v62 = vsel %vm1203_vm2, %v1233_v17, 0.0  ;;  %1275 = vst.msk [vmem:[%s1904_s16 + $0x30] sm:$0xff] %vm1203_vm2, %v1267_v22  ;;  %v1030_v55 = vadd.f32 %v1020_v61, %v944_v58  ;;  %v1106_v63 = vpop.f32.mrf.mxu3 }
 0x11e   : > { %v1247_v0 = vadd.f32 %v1246_v62, %v1245_v32 }
 0x11f   : > { %v1116_v34 = vadd.f32 %v1106_v63, %v1030_v55 }
 0x121   : > { %v1202_v23 = vadd.f32 %v1192_v1, %v1116_v34 }
 0x123   : > { %v1217_v4 = vsel %vm1203_vm2, %v1202_v23, 0.0  ;;  %v1234_v5 = vmul.f32 %v1202_v23, %v1202_v23  ;;  %v1268_v6 = vadd.f32 %v1898_v52, %v1202_v23 }
 0x124   : > { %v1218_v7 = vadd.f32 %v1217_v4, %v1216_v38 }
 0x125   : > { %v1248_v8 = vsel %vm1203_vm2, %v1234_v5, 0.0  ;;  %1276 = vst.msk [vmem:[%s1904_s16 + $0x38] sm:$0xff] %vm1203_vm2, %v1268_v6 }
 0x126   : > { %v1219_v9 = vrot.slane %v1218_v7, 4  ;;  %v1249_v10 = vadd.f32 %v1248_v8, %v1247_v0 }
 0x128   : > { %v1220_v2 = vadd.f32 %v1219_v9, %v1218_v7  ;;  %v1250_v24 = vrot.slane %v1249_v10, 4 }
 0x12a   : > { %v1221_v21 = vrot.slane %v1220_v2, 2  ;;  %v1251_v26 = vadd.f32 %v1250_v24, %v1249_v10 }
 0x12c   : > { %v1222_v11 = vadd.f32 %v1221_v21, %v1220_v2  ;;  %v1252_v12 = vrot.slane %v1251_v26, 2 }
 0x12e   : > { %v1223_v14 = vrot.slane %v1222_v11, 1  ;;  %v1253_v33 = vadd.f32 %v1252_v12, %v1251_v26 }
 0x130   : > { %v1224_v52 = vadd.f32 %v1223_v14, %v1222_v11  ;;  %v1254_v15 = vrot.slane %v1253_v33, 1 }
 0x132   : > { %1226 = vst.msk [vmem:[%s443_s19] sm:$0x1] %vm1225_vm3, %v1224_v52  ;;  %v1255_v35 = vadd.f32 %v1254_v15, %v1253_v33 }
 0x134   : > { %1256 = vst.msk [vmem:[%s443_s19 + $0x1] sm:$0x1] %vm1225_vm3, %v1255_v35 }
 0x135 PF: > { %s20_s30 = sadd.s32 1, %s1554_s30  }
 0x136   : > { %p17_p4 = scmp.ge.s32.totalorder %s20_s30, 4  }
 0x138   :  { %19 = sbr.rel (!%p17_p4) target bundleno = 1 (0x1), region = 117 }

</bundles_post_ra>
